<compile_context>
chip_gen: v5e
topology: v5e:2x2
jax: 0.10.0
libtpu: 0.0.40
codegen_flags: <defaults>
</compile_context>

<pallas_src>
import functools

import jax
import jax.numpy as jnp
from jax.experimental import pallas as pl
from jax.experimental.pallas import tpu as pltpu


# ===========================================================================
# Kernel 1: point_sample (detectron2) — bilinear grid_sample, zeros padding,
# align_corners=False — as separable one-hot weights + MXU batched matmul.
# ===========================================================================
def _bilinear_weights(px, py, H, W):
    """px, py: [RB, P] normalized coords in [0,1].
    Returns separable bilinear one-hot weights wx [RB,P,W], wy [RB,P,H]."""
    x = px * W - 0.5                      # align_corners=False unnormalization
    y = py * H - 0.5
    x0f = jnp.floor(x)
    y0f = jnp.floor(y)
    wx1 = x - x0f
    wx0 = 1.0 - wx1
    wy1 = y - y0f
    wy0 = 1.0 - wy1
    x0 = x0f.astype(jnp.int32)
    y0 = y0f.astype(jnp.int32)

    col_w = jax.lax.broadcasted_iota(jnp.int32, px.shape + (W,), 2)   # [RB,P,W]
    col_h = jax.lax.broadcasted_iota(jnp.int32, px.shape + (H,), 2)   # [RB,P,H]

    def one_hot(idx, wgt, n, col):
        # zero weight outside the image => grid_sample "zeros" padding
        inb = (idx >= 0) & (idx < n)
        w = jnp.where(inb, wgt, 0.0)
        return jnp.where(col == jnp.clip(idx, 0, n - 1)[..., None],
                         w[..., None], 0.0)

    wx = one_hot(x0, wx0, W, col_w) + one_hot(x0 + 1, wx1, W, col_w)   # [RB,P,W]
    wy = one_hot(y0, wy0, H, col_h) + one_hot(y0 + 1, wy1, H, col_h)   # [RB,P,H]
    return wx, wy


def _sample_image(wx, wy, img):
    """img: [RB, H, W] -> [RB, P]. The W-axis reduction runs on the MXU."""
    tmp = jnp.einsum('rpw,rhw->rph', wx, img.astype(jnp.float32),
                     preferred_element_type=jnp.float32)               # [RB,P,H]
    return jnp.sum(wy * tmp, axis=-1)                                  # [RB,P]


def _point_sample_kernel(img_ref, cx_ref, cy_ref, out_ref, *, H, W):
    wx, wy = _bilinear_weights(cx_ref[...].astype(jnp.float32),
                               cy_ref[...].astype(jnp.float32), H, W)
    out_ref[...] = _sample_image(wx, wy, img_ref[...]).astype(out_ref.dtype)


def _point_sample_pair_kernel(src_ref, tgt_ref, cx_ref, cy_ref,
                              logit_ref, label_ref, *, H, W):
    # One weight build + one coords DMA serve both images (fused sampling).
    wx, wy = _bilinear_weights(cx_ref[...].astype(jnp.float32),
                               cy_ref[...].astype(jnp.float32), H, W)
    logit_ref[...] = _sample_image(wx, wy, src_ref[...]).astype(logit_ref.dtype)
    label_ref[...] = _sample_image(wx, wy, tgt_ref[...]).astype(label_ref.dtype)


def _sample_rows_per_block(R):
    # Whole slab in one step when small; otherwise 16-row (8-aligned) blocks.
    # TODO(synk): at production sizes (P ~ 12k, larger masks) re-budget the
    # [RB,P,W]/[RB,P,H] f32 intermediates against scoped VMEM (v7x: 32 MiB
    # default of 64 MiB total) and drop RB to 8.
    return R if R <= 32 else 16


def point_sample(images, cx, cy):
    """images: [R, H, W]; cx, cy: [R, P] normalized coords in [0,1] -> [R, P] f32."""
    R, H, W = images.shape
    P = cx.shape[1]
    RB = _sample_rows_per_block(R)
    return pl.pallas_call(
        functools.partial(_point_sample_kernel, H=H, W=W),
        out_shape=jax.ShapeDtypeStruct((R, P), jnp.float32),
        grid=(pl.cdiv(R, RB),),
        in_specs=[pl.BlockSpec((RB, H, W), lambda i: (i, 0, 0)),
                  pl.BlockSpec((RB, P), lambda i: (i, 0)),
                  pl.BlockSpec((RB, P), lambda i: (i, 0))],
        out_specs=pl.BlockSpec((RB, P), lambda i: (i, 0)),
        compiler_params=pltpu.CompilerParams(dimension_semantics=("parallel",)),
    )(images.astype(jnp.bfloat16), cx.astype(jnp.float32),
      cy.astype(jnp.float32))


def point_sample_pair(src_images, tgt_images, cx, cy):
    """Sample src (logits) and tgt (labels) images at the same coords. -> 2x [R, P]."""
    R, H, W = src_images.shape
    P = cx.shape[1]
    RB = _sample_rows_per_block(R)
    return pl.pallas_call(
        functools.partial(_point_sample_pair_kernel, H=H, W=W),
        out_shape=(jax.ShapeDtypeStruct((R, P), jnp.float32),
                   jax.ShapeDtypeStruct((R, P), jnp.float32)),
        grid=(pl.cdiv(R, RB),),
        in_specs=[pl.BlockSpec((RB, H, W), lambda i: (i, 0, 0)),
                  pl.BlockSpec((RB, H, W), lambda i: (i, 0, 0)),
                  pl.BlockSpec((RB, P), lambda i: (i, 0)),
                  pl.BlockSpec((RB, P), lambda i: (i, 0))],
        out_specs=(pl.BlockSpec((RB, P), lambda i: (i, 0)),
                   pl.BlockSpec((RB, P), lambda i: (i, 0))),
        compiler_params=pltpu.CompilerParams(dimension_semantics=("parallel",)),
    )(src_images.astype(jnp.bfloat16), tgt_images.astype(jnp.bfloat16),
      cx.astype(jnp.float32), cy.astype(jnp.float32))


# ===========================================================================
# Kernel 2: weighted softmax cross-entropy (F.cross_entropy with class weights).
# Grid = (ncores "parallel", row-blocks "arbitrary"); each core accumulates
# (sum_i w[t_i]*nll_i, sum_i w[t_i]) into its own resident (8,128) block.
# ===========================================================================
def _weighted_ce_kernel(logits_ref, tgt_ref, w_ref, out_ref, *,
                        n_rows, block_rows, blocks_per_core):
    c = pl.program_id(0)
    i = pl.program_id(1)

    @pl.when(i == 0)
    def _init():
        out_ref[...] = jnp.zeros_like(out_ref)

    x = logits_ref[...].astype(jnp.float32)              # [BN, C]
    t = tgt_ref[...]                                      # [BN, 1] int32
    w = w_ref[...].astype(jnp.float32)                    # [1, C]

    # Mask rows of partial / duplicated blocks BEFORE any exp/log.
    blk = c * blocks_per_core + i
    row = blk * block_rows + jax.lax.broadcasted_iota(jnp.int32, (x.shape[0], 1), 0)
    valid = row < n_rows                                   # [BN, 1] bool
    x = jnp.where(valid, x, 0.0)

    m = jnp.max(x, axis=-1, keepdims=True)
    lse = m + jnp.log(jnp.sum(jnp.exp(x - m), axis=-1, keepdims=True))
    logp = x - lse                                         # [BN, C]

    cls = jax.lax.broadcasted_iota(jnp.int32, x.shape, 1)
    onehot = jnp.where(cls == t, 1.0, 0.0)                 # [BN, C]
    nll = -jnp.sum(logp * onehot, axis=-1, keepdims=True)  # [BN, 1]
    wi = jnp.sum(w * onehot, axis=-1, keepdims=True)       # [BN, 1]

    vf = jnp.where(valid, 1.0, 0.0)
    wnll_sum = jnp.sum(wi * nll * vf, axis=0, keepdims=True)   # [1, 1]
    wsum = jnp.sum(wi * vf, axis=0, keepdims=True)             # [1, 1]

    lane = jax.lax.broadcasted_iota(jnp.int32, out_ref.shape, 2)
    out_ref[...] += (jnp.where(lane == 0, wnll_sum, 0.0)
                     + jnp.where(lane == 1, wsum, 0.0))


def weighted_cross_entropy(logits, targets, class_weights):
    """Equivalent of F.cross_entropy(logits, targets, weight=class_weights) (mean)."""
    N, C = logits.shape
    BN = N if N <= 2048 else 1024                     # full dim or 8-aligned tile
    nblk = pl.cdiv(N, BN)
    ncores = 2 if nblk >= 2 else 1                    # v7x: split across both TCs
    bpc = pl.cdiv(nblk, ncores)
    tg = targets.astype(jnp.int32).reshape(N, 1)
    w = class_weights.astype(jnp.float32).reshape(1, C)

    def row_map(c, i):
        # clamp so duplicated tail steps re-read a valid block (masked in-kernel)
        return (jnp.minimum(c * bpc + i, nblk - 1), 0)

    out = pl.pallas_call(
        functools.partial(_weighted_ce_kernel, n_rows=N, block_rows=BN,
                          blocks_per_core=bpc),
        out_shape=jax.ShapeDtypeStruct((ncores, 8, 128), jnp.float32),
        grid=(ncores, bpc),
        in_specs=[pl.BlockSpec((BN, C), row_map),
                  pl.BlockSpec((BN, 1), row_map),
                  pl.BlockSpec((1, C), lambda c, i: (0, 0))],
        out_specs=pl.BlockSpec((1, 8, 128), lambda c, i: (c, 0, 0)),
        compiler_params=pltpu.CompilerParams(
            dimension_semantics=("parallel", "arbitrary")),
    )(logits, tg, w)
    return jnp.sum(out[:, 0, 0]) / jnp.sum(out[:, 0, 1])


# ===========================================================================
# Kernel 3: sigmoid_ce_loss + dice_loss, accumulated in-kernel.
# bf16 on the wire, f32 in-register; shared e = exp(-|x|) for BCE and sigmoid.
# ===========================================================================
def _mask_loss_kernel(logit_ref, label_ref, out_ref, *,
                      n_rows, block_rows, blocks_per_core, n_points):
    c = pl.program_id(0)
    i = pl.program_id(1)

    @pl.when(i == 0)
    def _init():
        out_ref[...] = jnp.zeros_like(out_ref)

    x = logit_ref[...].astype(jnp.float32)                # [BR, P]
    t = label_ref[...].astype(jnp.float32)                # [BR, P]

    blk = c * blocks_per_core + i
    row = blk * block_rows + jax.lax.broadcasted_iota(jnp.int32, (x.shape[0], 1), 0)
    valid = row < n_rows                                   # [BR, 1] bool
    x = jnp.where(valid, x, 0.0)
    t = jnp.where(valid, t, 0.0)

    # Shared e = exp(-|x|): one transcendental serves both BCE and sigmoid.
    e = jnp.exp(-jnp.abs(x))
    bce = jnp.maximum(x, 0.0) - x * t + jnp.log(1.0 + e)
    ce_row = jnp.sum(bce, axis=-1, keepdims=True) * (1.0 / float(n_points))

    # sigmoid(x) = where(x>=0, 1, e) / (1 + e) — approx reciprocal on the EUP.
    # (~1e-3 rel. error in loss_dice vs the PyTorch reference; fine for training.)
    p = jnp.where(x >= 0.0, 1.0, e) * pl.reciprocal(1.0 + e, approx=True)
    num = 2.0 * jnp.sum(p * t, axis=-1, keepdims=True)
    den = jnp.sum(p, axis=-1, keepdims=True) + jnp.sum(t, axis=-1, keepdims=True)
    dice_row = 1.0 - (num + 1.0) / (den + 1.0)

    vf = jnp.where(valid, 1.0, 0.0)
    ce_sum = jnp.sum(ce_row * vf, axis=0, keepdims=True)       # [1, 1]
    dice_sum = jnp.sum(dice_row * vf, axis=0, keepdims=True)   # [1, 1]

    lane = jax.lax.broadcasted_iota(jnp.int32, out_ref.shape, 2)
    out_ref[...] += (jnp.where(lane == 0, ce_sum, 0.0)
                     + jnp.where(lane == 1, dice_sum, 0.0))


def sigmoid_ce_and_dice(point_logits, point_labels, num_masks):
    R, P = point_logits.shape
    lg = point_logits.astype(jnp.bfloat16)
    lb = point_labels.astype(jnp.bfloat16)
    # Largest 8-aligned row tile such that one bf16 input block stays ~<=2 MiB
    # (2 inputs x 2 pipeline buffers -> <=8 MiB of input VMEM), capped at 1024.
    br_cap = max(8, min(1024, ((2 << 20) // (P * 2)) // 8 * 8))
    BR = R if R <= br_cap else br_cap
    nblk = pl.cdiv(R, BR)
    ncores = 2 if nblk >= 2 else 1                     # v7x: split across both TCs
    bpc = pl.cdiv(nblk, ncores)

    def row_map(c, i):
        return (jnp.minimum(c * bpc + i, nblk - 1), 0)

    out = pl.pallas_call(
        functools.partial(_mask_loss_kernel, n_rows=R, block_rows=BR,
                          blocks_per_core=bpc, n_points=P),
        out_shape=jax.ShapeDtypeStruct((ncores, 8, 128), jnp.float32),
        grid=(ncores, bpc),
        in_specs=[pl.BlockSpec((BR, P), row_map),
                  pl.BlockSpec((BR, P), row_map)],
        out_specs=pl.BlockSpec((1, 8, 128), lambda c, i: (c, 0, 0)),
        compiler_params=pltpu.CompilerParams(
            dimension_semantics=("parallel", "arbitrary"),
            vmem_limit_bytes=32 << 20),
    )(lg, lb)
    loss_mask = jnp.sum(out[:, 0, 0]) / num_masks
    loss_dice = jnp.sum(out[:, 0, 1]) / num_masks
    return loss_mask, loss_dice


# ---------------------------------------------------------------------------
# Plain-JAX glue (data-dependent point selection; no_grad in the original)
# ---------------------------------------------------------------------------
def get_uncertain_point_coords_with_randomness(key, coarse_logits, num_points,
                                               oversample_ratio,
                                               importance_sample_ratio):
    """coarse_logits: [R, H, W] -> (cx, cy) each [R, num_points] in [0,1]."""
    R = coarse_logits.shape[0]
    num_sampled = int(num_points * oversample_ratio)
    kx, ky, kr = jax.random.split(key, 3)
    pcx = jax.random.uniform(kx, (R, num_sampled), dtype=jnp.float32)
    pcy = jax.random.uniform(ky, (R, num_sampled), dtype=jnp.float32)
    pt_logits = point_sample(coarse_logits, pcx, pcy)          # [R, num_sampled]
    unc = -jnp.abs(pt_logits)                                  # calculate_uncertainty
    num_unc = int(importance_sample_ratio * num_points)
    num_rand = num_points - num_unc
    idx = jax.lax.top_k(unc, num_unc)[1]                       # [R, num_unc]
    sx = jnp.take_along_axis(pcx, idx, axis=1)
    sy = jnp.take_along_axis(pcy, idx, axis=1)
    if num_rand > 0:
        krx, kry = jax.random.split(kr)
        sx = jnp.concatenate(
            [sx, jax.random.uniform(krx, (R, num_rand), dtype=jnp.float32)], axis=1)
        sy = jnp.concatenate(
            [sy, jax.random.uniform(kry, (R, num_rand), dtype=jnp.float32)], axis=1)
    return sx, sy


# ---------------------------------------------------------------------------
# VideoSetCriterion (forward semantics)
# ---------------------------------------------------------------------------
class VideoSetCriterionPallas:
    def __init__(self, num_classes, weight_dict, eos_coef, losses,
                 num_points, oversample_ratio, importance_sample_ratio, frames=2):
        self.num_classes = num_classes
        self.weight_dict = weight_dict
        self.eos_coef = eos_coef
        self.losses = losses
        self.num_points = num_points
        self.oversample_ratio = oversample_ratio
        self.importance_sample_ratio = importance_sample_ratio
        self.frames = frames
        # empty_weight buffer: ones(num_classes+1), last = eos_coef
        self.empty_weight = jnp.ones(num_classes + 1, jnp.float32).at[-1].set(eos_coef)

    # TODO(synk): the real Hungarian matcher is an external data-dependent module;
    # a deterministic identity matching (query j <-> target j) is used here.
    def _matcher(self, outputs, targets):
        return [(jnp.arange(len(t['labels']), dtype=jnp.int32),
                 jnp.arange(len(t['labels']), dtype=jnp.int32)) for t in targets]

    def _get_src_permutation_idx(self, indices):
        batch_idx = jnp.concatenate(
            [jnp.full_like(src, i) for i, (src, _) in enumerate(indices)])
        src_idx = jnp.concatenate([src for src, _ in indices])
        return batch_idx, src_idx

    def loss_labels(self, outputs, targets, indices, num_masks):
        src_logits = outputs['pred_logits']                          # [B, Q, C+1]
        B, Q, C = src_logits.shape
        batch_idx, src_idx = self._get_src_permutation_idx(indices)
        target_classes_o = jnp.concatenate(
            [t['labels'][J] for t, (_, J) in zip(targets, indices)])
        target_classes = jnp.full((B, Q), self.num_classes, jnp.int32)
        target_classes = target_classes.at[batch_idx, src_idx].set(
            target_classes_o.astype(jnp.int32))
        loss_ce = weighted_cross_entropy(src_logits.reshape(B * Q, C),
                                         target_classes.reshape(B * Q),
                                         self.empty_weight)
        return {'loss_ce': loss_ce}

    def loss_masks(self, outputs, targets, indices, num_masks, key):
        batch_idx, src_idx = self._get_src_permutation_idx(indices)
        src_masks = outputs['pred_masks'][batch_idx, src_idx]        # [M, T, H, W]
        target_masks = jnp.concatenate(
            [t['masks'][i] for t, (_, i) in zip(targets, indices)]
        ).astype(src_masks.dtype)                                    # [M, T, H, W]
        M, T, H, W = src_masks.shape
        src_masks = src_masks.reshape(M * T, H, W)
        target_masks = target_masks.reshape(M * T, H, W)
        # (no_grad in original) uncertainty-based point selection
        cx, cy = get_uncertain_point_coords_with_randomness(
            key, src_masks, self.num_points, self.oversample_ratio,
            self.importance_sample_ratio)
        # Fused sampling of logits (src) and labels (tgt) at the same coords.
        point_logits, point_labels = point_sample_pair(src_masks, target_masks,
                                                       cx, cy)       # [R, P] each
        loss_mask, loss_dice = sigmoid_ce_and_dice(point_logits, point_labels,
                                                   num_masks)
        return {'loss_mask': loss_mask, 'loss_dice': loss_dice}

    def forward(self, outputs, targets, key, use_contrast=False):
        indices = self._matcher(outputs, targets)
        num_masks = sum(len(t['labels']) for t in targets)
        num_masks = float(max(num_masks, 1))   # single device: world_size == 1
        losses = {}
        for loss in self.losses:
            if loss == 'contrast' and use_contrast is False:
                continue
            if loss == 'labels':
                losses.update(self.loss_labels(outputs, targets, indices, num_masks))
            elif loss == 'masks':
                losses.update(self.loss_masks(outputs, targets, indices, num_masks,
                                              key))
            # TODO(synk): 'contrast' loss (per-video id matching, topk over box
            # distances) is heavily data-dependent host logic; not ported.
        # TODO(synk): aux_outputs loop omitted (no aux_outputs in this example).
        return losses


# ---------------------------------------------------------------------------
if __name__ == "__main__":
    key = jax.random.PRNGKey(0)
    B, Q, T, H, W = 2, 8, 2, 16, 16
    num_classes = 4
    num_points = 64
    n_targets = 3

    k_logits, k_masks, k_lab, k_tmask, k_pts = jax.random.split(key, 5)

    outputs = {
        'pred_logits': jax.random.normal(k_logits, (B, Q, num_classes + 1),
                                         jnp.float32),
        'pred_masks': jax.random.normal(k_masks, (B, Q, T, H, W), jnp.float32),
    }
    targets = []
    lab_keys = jax.random.split(k_lab, B)
    msk_keys = jax.random.split(k_tmask, B)
    for b in range(B):
        labels = jax.random.randint(lab_keys[b], (n_targets,), 0, num_classes,
                                    jnp.int32)
        masks = (jax.random.uniform(msk_keys[b], (n_targets, T, H, W)) > 0.5
                 ).astype(jnp.float32)
        targets.append({'labels': labels, 'masks': masks})

    criterion = VideoSetCriterionPallas(
        num_classes=num_classes,
        weight_dict={'loss_ce': 2.0, 'loss_mask': 5.0, 'loss_dice': 5.0},
        eos_coef=0.1,
        losses=['labels', 'masks'],
        num_points=num_points,
        oversample_ratio=3,
        importance_sample_ratio=0.75,
        frames=T,
    )

    losses = criterion.forward(outputs, targets, k_pts, use_contrast=False)
    for v in losses.values():
        jax.block_until_ready(v)
    assert all(bool(jnp.isfinite(v)) for v in losses.values())
    print("KERNEL_OK")
</pallas_src>

<mosaic_0001>
module attributes {stable_mosaic.version = 11 : i64} {
  func.func @_weighted_ce_kernel(%arg0: i32, %arg1: i32, %arg2: memref<16x5xf32, #tpu.memory_space<vmem>>, %arg3: memref<16x1xi32, #tpu.memory_space<vmem>>, %arg4: memref<1x5xf32, #tpu.memory_space<vmem>>, %arg5: memref<1x8x128xf32, #tpu.memory_space<vmem>>) attributes {dimension_semantics = [#tpu.dimension_semantics<parallel>, #tpu.dimension_semantics<arbitrary>], iteration_bounds = array<i64: 1, 1>, scalar_prefetch = 0 : i64, scratch_operands = 0 : i64, tpu.core_type = #tpu.core_type<tc>, window_params = [{transform_indices = @transform_0, window_bounds = array<i64: 16, 5>}, {transform_indices = @transform_1, window_bounds = array<i64: 16, 1>}, {pipeline_mode = #tpu.pipeline_mode<synchronous>, transform_indices = @transform_2, window_bounds = array<i64: 1, 5>}, {transform_indices = @transform_3, window_bounds = array<i64: 1, 8, 128>}]} {
    %c0_i32 = arith.constant 0 : i32
    %0 = arith.cmpi eq, %arg1, %c0_i32 : i32
    %1 = arith.extui %0 : i1 to i32
    %c0_i32_0 = arith.constant 0 : i32
    %2 = arith.cmpi ne, %1, %c0_i32_0 : i32
    scf.if %2 {
      %cst_28 = arith.constant 0.000000e+00 : f32
      %71 = vector.broadcast %cst_28 : f32 to vector<1x8x128xf32>
      %c0_29 = arith.constant 0 : index
      %c0_30 = arith.constant 0 : index
      %c0_31 = arith.constant 0 : index
      %72 = vector.load %arg5[%c0_29, %c0_30, %c0_31] : memref<1x8x128xf32, #tpu.memory_space<vmem>>, vector<1x8x128xf32>
      tpu.vector_store %arg5[%c0_29, %c0_30, %c0_31], %71 {strides = array<i32>} : memref<1x8x128xf32, #tpu.memory_space<vmem>>, vector<1x8x128xf32>,
    } else {
    }
    %c0 = arith.constant 0 : index
    %c0_1 = arith.constant 0 : index
    %3 = vector.load %arg2[%c0, %c0_1] : memref<16x5xf32, #tpu.memory_space<vmem>>, vector<16x5xf32>
    %c0_2 = arith.constant 0 : index
    %c0_3 = arith.constant 0 : index
    %4 = vector.load %arg3[%c0_2, %c0_3] : memref<16x1xi32, #tpu.memory_space<vmem>>, vector<16x1xi32>
    %c0_4 = arith.constant 0 : index
    %c0_5 = arith.constant 0 : index
    %5 = vector.load %arg4[%c0_4, %c0_5] : memref<1x5xf32, #tpu.memory_space<vmem>>, vector<1x5xf32>
    %c1_i32 = arith.constant 1 : i32
    %6 = arith.muli %arg0, %c1_i32 : i32
    %7 = arith.addi %6, %arg1 : i32
    %c16_i32 = arith.constant 16 : i32
    %8 = arith.muli %7, %c16_i32 : i32
    %9 = tpu.iota {dimensions = array<i32: 0>} : vector<16x1xi32>
    %10 = vector.broadcast %8 : i32 to vector<16x1xi32>
    %11 = arith.addi %10, %9 : vector<16x1xi32>
    %c16_i32_6 = arith.constant 16 : i32
    %12 = vector.broadcast %c16_i32_6 : i32 to vector<16x1xi32>
    %13 = arith.cmpi slt, %11, %12 : vector<16x1xi32>
    %cst = arith.constant 0.000000e+00 : f32
    %14 = vector.shape_cast %13 : vector<16x1xi1> to vector<16x1xi1>
    %15 = vector.broadcast %14 : vector<16x1xi1> to vector<16x5xi1>
    %16 = vector.broadcast %cst : f32 to vector<16x5xf32>
    %17 = arith.select %15, %3, %16 : vector<16x5xi1>, vector<16x5xf32>
    %cst_7 = arith.constant dense<0xFF800000> : vector<16xf32>
    %18 = vector.multi_reduction <maximumf>, %17, %cst_7 [1] : vector<16x5xf32> to vector<16xf32>
    %19 = vector.shape_cast %18 : vector<16xf32> to vector<16x1xf32>
    %20 = vector.broadcast %19 : vector<16x1xf32> to vector<16x5xf32>
    %21 = arith.subf %17, %20 : vector<16x5xf32>
    %22 = math.exp %21 : vector<16x5xf32>
    %cst_8 = arith.constant dense<0.000000e+00> : vector<16xf32>
    %23 = vector.multi_reduction <add>, %22, %cst_8 [1] : vector<16x5xf32> to vector<16xf32>
    %24 = vector.shape_cast %23 : vector<16xf32> to vector<16x1xf32>
    %25 = math.log %24 : vector<16x1xf32>
    %26 = arith.addf %19, %25 : vector<16x1xf32>
    %27 = vector.broadcast %26 : vector<16x1xf32> to vector<16x5xf32>
    %28 = arith.subf %17, %27 : vector<16x5xf32>
    %29 = tpu.iota {dimensions = array<i32: 1>} : vector<16x5xi32>
    %30 = vector.broadcast %4 : vector<16x1xi32> to vector<16x5xi32>
    %31 = arith.cmpi eq, %29, %30 : vector<16x5xi32>
    %cst_9 = arith.constant 1.000000e+00 : f32
    %cst_10 = arith.constant 0.000000e+00 : f32
    %32 = vector.broadcast %cst_9 : f32 to vector<16x5xf32>
    %33 = vector.broadcast %cst_10 : f32 to vector<16x5xf32>
    %34 = arith.select %31, %32, %33 : vector<16x5xi1>, vector<16x5xf32>
    %35 = arith.mulf %28, %34 : vector<16x5xf32>
    %cst_11 = arith.constant dense<0.000000e+00> : vector<16xf32>
    %36 = vector.multi_reduction <add>, %35, %cst_11 [1] : vector<16x5xf32> to vector<16xf32>
    %37 = vector.shape_cast %36 : vector<16xf32> to vector<16x1xf32>
    %cst_12 = arith.constant 0.000000e+00 : f32
    %38 = vector.broadcast %cst_12 : f32 to vector<16x1xf32>
    %39 = arith.subf %38, %37 : vector<16x1xf32>
    %40 = vector.broadcast %5 : vector<1x5xf32> to vector<16x5xf32>
    %41 = arith.mulf %40, %34 : vector<16x5xf32>
    %cst_13 = arith.constant dense<0.000000e+00> : vector<16xf32>
    %42 = vector.multi_reduction <add>, %41, %cst_13 [1] : vector<16x5xf32> to vector<16xf32>
    %43 = vector.shape_cast %42 : vector<16xf32> to vector<16x1xf32>
    %cst_14 = arith.constant 1.000000e+00 : f32
    %cst_15 = arith.constant 0.000000e+00 : f32
    %44 = vector.broadcast %cst_14 : f32 to vector<16x1xf32>
    %45 = vector.broadcast %cst_15 : f32 to vector<16x1xf32>
    %46 = arith.select %13, %44, %45 : vector<16x1xi1>, vector<16x1xf32>
    %47 = arith.mulf %43, %39 : vector<16x1xf32>
    %48 = arith.mulf %47, %46 : vector<16x1xf32>
    %cst_16 = arith.constant dense<0.000000e+00> : vector<1xf32>
    %49 = vector.multi_reduction <add>, %48, %cst_16 [0] : vector<16x1xf32> to vector<1xf32>
    %50 = vector.shape_cast %49 : vector<1xf32> to vector<1x1xf32>
    %51 = arith.mulf %43, %46 : vector<16x1xf32>
    %cst_17 = arith.constant dense<0.000000e+00> : vector<1xf32>
    %52 = vector.multi_reduction <add>, %51, %cst_17 [0] : vector<16x1xf32> to vector<1xf32>
    %53 = vector.shape_cast %52 : vector<1xf32> to vector<1x1xf32>
    %54 = tpu.iota {dimensions = array<i32: 2>} : vector<1x8x128xi32>
    %c0_18 = arith.constant 0 : index
    %c0_19 = arith.constant 0 : index
    %c0_20 = arith.constant 0 : index
    %55 = vector.load %arg5[%c0_18, %c0_19, %c0_20] : memref<1x8x128xf32, #tpu.memory_space<vmem>>, vector<1x8x128xf32>
    %c0_i32_21 = arith.constant 0 : i32
    %56 = vector.broadcast %c0_i32_21 : i32 to vector<1x8x128xi32>
    %57 = arith.cmpi eq, %54, %56 : vector<1x8x128xi32>
    %cst_22 = arith.constant 0.000000e+00 : f32
    %58 = vector.shape_cast %50 : vector<1x1xf32> to vector<1x1x1xf32>
    %59 = vector.broadcast %58 : vector<1x1x1xf32> to vector<1x8x128xf32>
    %60 = vector.broadcast %cst_22 : f32 to vector<1x8x128xf32>
    %61 = arith.select %57, %59, %60 : vector<1x8x128xi1>, vector<1x8x128xf32>
    %c1_i32_23 = arith.constant 1 : i32
    %62 = vector.broadcast %c1_i32_23 : i32 to vector<1x8x128xi32>
    %63 = arith.cmpi eq, %54, %62 : vector<1x8x128xi32>
    %cst_24 = arith.constant 0.000000e+00 : f32
    %64 = vector.shape_cast %53 : vector<1x1xf32> to vector<1x1x1xf32>
    %65 = vector.broadcast %64 : vector<1x1x1xf32> to vector<1x8x128xf32>
    %66 = vector.broadcast %cst_24 : f32 to vector<1x8x128xf32>
    %67 = arith.select %63, %65, %66 : vector<1x8x128xi1>, vector<1x8x128xf32>
    %68 = arith.addf %61, %67 : vector<1x8x128xf32>
    %69 = arith.addf %55, %68 : vector<1x8x128xf32>
    %c0_25 = arith.constant 0 : index
    %c0_26 = arith.constant 0 : index
    %c0_27 = arith.constant 0 : index
    %70 = vector.load %arg5[%c0_25, %c0_26, %c0_27] : memref<1x8x128xf32, #tpu.memory_space<vmem>>, vector<1x8x128xf32>
    tpu.vector_store %arg5[%c0_25, %c0_26, %c0_27], %69 {strides = array<i32>} : memref<1x8x128xf32, #tpu.memory_space<vmem>>, vector<1x8x128xf32>,
    return
  }
  func.func @transform_0(%arg0: i32, %arg1: i32) -> (i32, i32) {
    %c1_i32 = arith.constant 1 : i32
    %0 = arith.muli %arg0, %c1_i32 : i32
    %1 = arith.addi %0, %arg1 : i32
    %c0_i32 = arith.constant 0 : i32
    %2 = arith.minsi %1, %c0_i32 : i32
    %c0_i32_0 = arith.constant 0 : i32
    %c0_i32_1 = arith.constant 0 : i32
    return %2, %c0_i32_0 : i32, i32
  }
  func.func @transform_1(%arg0: i32, %arg1: i32) -> (i32, i32) {
    %c1_i32 = arith.constant 1 : i32
    %0 = arith.muli %arg0, %c1_i32 : i32
    %1 = arith.addi %0, %arg1 : i32
    %c0_i32 = arith.constant 0 : i32
    %2 = arith.minsi %1, %c0_i32 : i32
    %c0_i32_0 = arith.constant 0 : i32
    %c0_i32_1 = arith.constant 0 : i32
    return %2, %c0_i32_0 : i32, i32
  }
  func.func @transform_2(%arg0: i32, %arg1: i32) -> (i32, i32) {
    %c0_i32 = arith.constant 0 : i32
    %c0_i32_0 = arith.constant 0 : i32
    %c0_i32_1 = arith.constant 0 : i32
    return %c0_i32, %c0_i32_0 : i32, i32
  }
  func.func @transform_3(%arg0: i32, %arg1: i32) -> (i32, i32, i32) {
    %c0_i32 = arith.constant 0 : i32
    %c0_i32_0 = arith.constant 0 : i32
    %c0_i32_1 = arith.constant 0 : i32
    return %arg0, %c0_i32, %c0_i32_0 : i32, i32, i32
  }
}

</mosaic_0001>

<bundles_post_ra>
// kernel: tpu_custom_call.1
= control target key start
LH: loop header
LB: loop body
LE: loop exit
PB: predicated region body
PF: predicated region fallthrough
CT: control target
= control target key end

     0   :  { %vm105_vm0 = vcmask 39936   ;;  %s312_s0 = inlined_call_operand.vmem [shape: f32[16,5], index: 0, kind: input, shape index: {}]   ;;  %s313_s1 = inlined_call_operand.vmem [shape: s32[16,1], index: 1, kind: input, shape index: {}]   ;;  %s314_s2 = inlined_call_operand.vmem [shape: f32[1,5], index: 2, kind: input, shape index: {}]   ;;  %s315_s3 = inlined_call_operand.hbm [shape: f32[1,8,128], index: 3, kind: output, shape index: {}]  }
   0x1   :  { %v84_v0 = vld [vmem:[%s312_s0] sm:$0xff] }
   0x2   :  { %v106_v1 = vsel %vm105_vm0, %v84_v0, -inf }
   0x3   :  { %8 = vsyncpa [#allocation3], 0  ;;  %107 = vmax.xlane.f32.xlu0 %v106_v1  ;;  %v85_v2 = vld [vmem:[%s312_s0 + $0x8] sm:$0xff]  ;;  %v86_v4 = vld [vmem:[%s313_s1] sm:$0xff]  ;;  %v263_v5 = vmov 0   ;;  %v132_v17 = vlaneseq  ;;  %v264_v21 = vmov 0.0  }
   0x4   :  { %v109_v3 = vsel %vm105_vm0, %v85_v2, -inf  ;;  %226 = vset.pattern.permute.xlu2 %v263_v5  ;;  %227 = vset.pattern.permute.xlu0 %v263_v5  ;;  %v87_v6 = vld [vmem:[%s313_s1 + $0x8] sm:$0xff]  ;;  %v228_v20 = vld [vmem:[%s314_s2] ss:$0 sm:$0xff]  ;;  %s265_s2 = smov [#allocation2]   ;;  %s202_s23 = sshll.u32 %s315_s3, 4  ;;  %s203_s23 = int_to_ptr.hbm [resolvable:$true] %s202_s23 }
   0x5   :  { %135 = vperm.xlu2 %226, %v86_v4   ;;  %v133_v18 = vand.u32 127, %v132_v17  ;;  %s200_s20 = sshll.u32 %s265_s2, 4  ;;  %s201_s20 = int_to_ptr.vmem [resolvable:$true] %s200_s20 }
   0x7   :  { %vm190_vm3 = vcmp.eq.s32.totalorder %v133_v18, 1  ;;  %vm188_vm4 = vcmp.eq.s32.totalorder %v133_v18, 0 }
   0xb   :  { %110 = vmax.xlane.f32.xlu0 %v109_v3 }
   0xd   :  { %138 = vperm.xlu2 %226, %v87_v6  }
  0x5f   :  { %v136_v19 = vpop.permute.xlu2 %135 }
  0x60   :  { %vm140_vm1 = vcmp.eq.s32.totalorder %v133_v18, %v136_v19 }
  0x61   :  { %v142_v22 = vsel %vm140_vm1, 1.0, %v264_v21 }
  0x62   :  { %v157_v23 = vmul.f32 %v228_v20, %v142_v22 }
  0x64   :  { %v159_v24 = vsel %vm105_vm0, %v157_v23, 0.0 }
  0x65   :  { %160 = vadd.xlane.f32.xlu2 %v159_v24 }
  0x67   :  { %v139_v30 = vpop.permute.xlu2 %138 }
  0x68   :  { %vm141_vm2 = vcmp.eq.s32.totalorder %v133_v18, %v139_v30 }
  0x69   :  { %v143_v36 = vsel %vm141_vm2, 1.0, %v264_v21 }
  0x6a   :  { %v158_v39 = vmul.f32 %v228_v20, %v143_v36 }
  0x6c   :  { %v162_v42 = vsel %vm105_vm0, %v158_v39, 0.0 }
  0x76   :  { %v108_v7 = vpop.xlane.xlu0 %107 }
  0x77   :  { %v112_v8 = vsub.f32 %v84_v0, %v108_v7 }
  0x79   :  { %v114_v9 = vmul.f32 1.442695, %v112_v8 }
  0x7b   :  { %229 = vpow2.f32 %v114_v9 }
  0x7e   :  { %v111_v10 = vpop.xlane.xlu0 %110 }
  0x7f   :  { %v113_v11 = vsub.f32 %v85_v2, %v111_v10 }
  0x81   :  { %v230_v12 = vpop.eup %229  ;;  %v116_v13 = vmul.f32 1.442695, %v113_v11 }
  0x82   :  { %v118_v14 = vsel %vm105_vm0, %v230_v12, 0.0 }
  0x83   :  { %231 = vpow2.f32 %v116_v13  ;;  %119 = vadd.xlane.f32.xlu1 %v118_v14 }
  0x89   :  { %v232_v15 = vpop.eup %231 }
  0x8a   :  { %v121_v16 = vsel %vm105_vm0, %v232_v15, 0.0 }
  0x8b   :  { %122 = vadd.xlane.f32.xlu1 %v121_v16 }
  0xd8   :  { %v161_v44 = vpop.xlane.xlu2 %160 }
  0xf6   :  { %v120_v25 = vpop.xlane.xlu1 %119 }
  0xf7   :  { %233 = vlog2.f32 %v120_v25 }
  0xfd   :  { %v234_v26 = vpop.eup %233 }
  0xfe   :  { %v125_v27 = vmul.f32 0.6931472, %v234_v26  ;;  %v123_v28 = vpop.xlane.xlu1 %122 }
  0xff   :  { %235 = vlog2.f32 %v123_v28 }
 0x100   :  { %v128_v29 = vadd.f32 %v125_v27, %v108_v7 }
 0x102   :  { %v130_v31 = vsub.f32 %v84_v0, %v128_v29 }
 0x104   :  { %v144_v32 = vmul.f32 %v142_v22, %v130_v31 }
 0x105   :  { %v236_v33 = vpop.eup %235 }
 0x106   :  { %v127_v34 = vmul.f32 0.6931472, %v236_v33  ;;  %v146_v35 = vsel %vm105_vm0, %v144_v32, 0.0 }
 0x107   :  { %147 = vadd.xlane.f32.xlu0 %v146_v35 }
 0x108   :  { %v129_v37 = vadd.f32 %v127_v34, %v111_v10 }
 0x10a   :  { %v131_v38 = vsub.f32 %v85_v2, %v129_v37 }
 0x10c   :  { %v145_v40 = vmul.f32 %v143_v36, %v131_v38 }
 0x10e   :  { %v149_v41 = vsel %vm105_vm0, %v145_v40, 0.0 }
 0x10f   :  { %150 = vadd.xlane.f32.xlu1 %v149_v41  ;;  %163 = vadd.xlane.f32.xlu0 %v162_v42 }
 0x17a   :  { %v148_v43 = vpop.xlane.xlu0 %147 }
 0x17b   :  { %v152_v45 = vsub.f32 0.0, %v148_v43 }
 0x17d   :  { %v167_v50 = vmul.f32 %v161_v44, %v152_v45 }
 0x182   :  { %v151_v46 = vpop.xlane.xlu1 %150  ;;  %v164_v47 = vpop.xlane.xlu0 %163 }
 0x183   :  { %v153_v48 = vsub.f32 0.0, %v151_v46  ;;  %v180_v49 = vadd.f32 %v164_v47, %v161_v44 }
 0x185   :  { %v168_v51 = vmul.f32 %v164_v47, %v153_v48  ;;  %v181_v52 = vrot.slane %v180_v49, 4 }
 0x187   :  { %v171_v53 = vadd.f32 %v168_v51, %v167_v50  ;;  %v182_v54 = vadd.f32 %v181_v52, %v180_v49 }
 0x189   :  { %v172_v55 = vrot.slane %v171_v53, 4  ;;  %v183_v56 = vrot.slane %v182_v54, 2 }
 0x18b   :  { %v173_v57 = vadd.f32 %v172_v55, %v171_v53  ;;  %v184_v58 = vadd.f32 %v183_v56, %v182_v54 }
 0x18d   :  { %v174_v59 = vrot.slane %v173_v57, 2  ;;  %v185_v60 = vrot.slane %v184_v58, 1 }
 0x18f   :  { %v175_v61 = vadd.f32 %v174_v59, %v173_v57  ;;  %v186_v63 = vadd.f32 %v185_v60, %v184_v58 }
 0x191   :  { %v176_v62 = vrot.slane %v175_v61, 1  ;;  %v191_v1 = vsel %vm190_vm3, %v186_v63, 0.0 }
 0x193   :  { %v177_v0 = vadd.f32 %v176_v62, %v175_v61 }
 0x195   :  { %v189_v2 = vsel %vm188_vm4, %v177_v0, 0.0 }
 0x196   :  { %v192_v3 = vadd.f32 %v191_v1, %v189_v2 }
 0x198   :  { %194 = vst [vmem:[#allocation2] sm:$0xff] %v192_v3 }
 0x199   :  { %205 = dma.vmem_to_hbm [thread:$0]  %s201_s20, 128, %s203_s23, [#allocation3]  }
 0x19a   :  { %261 = dma.done.wait [#allocation3], 128  }
 0x19b   :  { %262 = vsyncadd [#allocation3], 4294967168 }
 0x19c   :  { %210 = vsyncpa [#allocation3], 1 }

</bundles_post_ra>
